<compile_context>
chip_gen: v7x
topology: tpu7x:2x2x1
jax: 0.10.0
libtpu: 0.0.40
codegen_flags: <defaults>
</compile_context>

<pallas_src>
import functools
import math

import jax
import jax.numpy as jnp
import numpy as np
from jax.experimental import pallas as pl
from jax.experimental.pallas import tpu as pltpu


def _round_up(x, m):
    return ((x + m - 1) // m) * m


# ----------------------------------------------------------------------------
# Kernel 1: tiled linear / 1x1-conv (backbone). Normalization is folded into
# the weights by the caller, so preprocess+backbone is one HBM-bound matmul.
# ----------------------------------------------------------------------------
def _linear_kernel(x_ref, w_ref, b_ref, o_ref, *, relu):
    acc = jnp.dot(x_ref[...], w_ref[...], preferred_element_type=jnp.float32)
    acc = acc + b_ref[...]
    if relu:
        acc = jnp.maximum(acc, 0.0)
    o_ref[...] = acc.astype(o_ref.dtype)


def pallas_linear(x, w, b, relu=False, tile_m=1024):
    """x: (M, K), w: (K, N), b: (N,) -> (M, N) float32, rows tiled over a grid."""
    M, K = x.shape
    N = w.shape[1]
    tile_m = min(tile_m, _round_up(M, 8))          # tile is always a multiple of 8
    M_pad = _round_up(M, tile_m)
    if M_pad != M:
        x = jnp.pad(x, ((0, M_pad - M), (0, 0)))
    grid = (M_pad // tile_m,)
    out = pl.pallas_call(
        functools.partial(_linear_kernel, relu=relu),
        out_shape=jax.ShapeDtypeStruct((M_pad, N), jnp.float32),
        grid=grid,
        in_specs=[
            pl.BlockSpec((tile_m, K), lambda i: (i, 0)),
            pl.BlockSpec((K, N), lambda i: (0, 0)),
            pl.BlockSpec((1, N), lambda i: (0, 0)),
        ],
        out_specs=pl.BlockSpec((tile_m, N), lambda i: (i, 0)),
        compiler_params=pltpu.CompilerParams(
            dimension_semantics=("parallel",),      # shard rows across TCs on v7x
            vmem_limit_bytes=48 * 1024 * 1024,
        ),
    )(x, w, b.reshape(1, N))
    return out[:M] if M_pad != M else out


# ----------------------------------------------------------------------------
# Kernel 2: ROI gather (integer-aligned crop, ROIAlign stand-in).
# Scalar-prefetch box table in SMEM + manual DMA gather from the HBM feature
# map laid out as (B*H, W*C) so each crop is a lane-dense (P, P*C) rectangle.
# ----------------------------------------------------------------------------
def _roi_gather_kernel(boxes_ref, feat_ref, o_ref, buf, sems, *,
                       P, C, H, rois_per_step):
    step = pl.program_id(0)
    base = step * rois_per_step
    copies = []
    for j in range(rois_per_step):                 # static unroll (tiny count)
        off = (base + j) * 3
        b = boxes_ref[off]
        y0 = boxes_ref[off + 1]
        x0 = boxes_ref[off + 2]
        cp = pltpu.make_async_copy(
            feat_ref.at[pl.ds(b * H + y0, P), pl.ds(x0 * C, P * C)],
            buf.at[pl.ds(j * P, P), :],
            sems.at[j],
        )
        cp.start()
        copies.append(cp)
    for cp in copies:
        cp.wait()
    o_ref[...] = buf[...]


def pallas_roi_pool(feat_nhwc, boxes, pool):
    """feat_nhwc: (B, H, W, C); boxes: (R, 3) int32 rows of (batch, y0, x0).

    Returns (R, pool*pool*C) float32, rows flattened in (y, x, c) order.
    """
    B, H, W, C = feat_nhwc.shape
    P = pool
    lane = P * C
    assert lane % 128 == 0, "pool * C must be a multiple of 128 for the gather"
    rois_per_step = 8 // math.gcd(P, 8)            # keep block sublane dim % 8 == 0

    boxes = boxes.astype(jnp.int32)
    R = boxes.shape[0]
    R_pad = _round_up(R, rois_per_step)
    if R_pad != R:
        boxes = jnp.pad(boxes, ((0, R_pad - R), (0, 0)))  # dummy (0,0,0) boxes
    boxes_flat = boxes.reshape(-1)

    feat2d = feat_nhwc.reshape(B * H, W * C)       # rows = (b, y), lanes = (x, c)

    out = pl.pallas_call(
        functools.partial(_roi_gather_kernel, P=P, C=C, H=H,
                          rois_per_step=rois_per_step),
        out_shape=jax.ShapeDtypeStruct((R_pad * P, lane), feat_nhwc.dtype),
        grid_spec=pltpu.PrefetchScalarGridSpec(
            num_scalar_prefetch=1,
            grid=(R_pad // rois_per_step,),
            in_specs=[pl.BlockSpec(memory_space=pl.ANY)],       # feature map in HBM
            out_specs=pl.BlockSpec((rois_per_step * P, lane),
                                   lambda s, tbl: (s, 0)),
            scratch_shapes=[
                pltpu.VMEM((rois_per_step * P, lane), feat_nhwc.dtype),
                pltpu.SemaphoreType.DMA((rois_per_step,)),
            ],
        ),
        compiler_params=pltpu.CompilerParams(
            dimension_semantics=("arbitrary",)),
    )(boxes_flat, feat2d)
    return out.reshape(R_pad, P * lane)[:R]


# ----------------------------------------------------------------------------
# Kernel 3: fused ROI head — box_head (2x FC + ReLU) + box_predictor in one
# pallas_call; predictor weights concatenated and zero-padded to a lane-dense
# 128-multiple N (unmasked stores); logits / bbox deltas sliced outside.
# ----------------------------------------------------------------------------
def _roi_head_kernel(x_ref, w1_ref, b1_ref, w2_ref, b2_ref, w3_ref, b3_ref, o_ref):
    h = jnp.dot(x_ref[...], w1_ref[...], preferred_element_type=jnp.float32)
    h = jnp.maximum(h + b1_ref[...], 0.0)
    h = jnp.dot(h, w2_ref[...], preferred_element_type=jnp.float32)
    h = jnp.maximum(h + b2_ref[...], 0.0)
    o_ref[...] = (jnp.dot(h, w3_ref[...], preferred_element_type=jnp.float32)
                  + b3_ref[...])


def pallas_roi_head(pooled, fc1_w, fc1_b, fc2_w, fc2_b, cls_w, cls_b, box_w, box_b):
    R, _ = pooled.shape
    n_logit = cls_w.shape[1]
    n_bbox = box_w.shape[1]
    n_cat = n_logit + n_bbox
    n_pad = _round_up(n_cat, 128)
    w3 = jnp.pad(jnp.concatenate([cls_w, box_w], axis=1),
                 ((0, 0), (0, n_pad - n_cat)))
    b3 = jnp.pad(jnp.concatenate([cls_b, box_b], axis=0), ((0, n_pad - n_cat),))
    out = pl.pallas_call(
        _roi_head_kernel,
        out_shape=jax.ShapeDtypeStruct((R, n_pad), jnp.float32),
    )(pooled, fc1_w, fc1_b.reshape(1, -1), fc2_w, fc2_b.reshape(1, -1),
      w3, b3.reshape(1, -1))
    return out[:, :n_logit], out[:, n_logit:n_cat]


# ----------------------------------------------------------------------------
# Kernel 4: DKD loss (decoupled KD: TCKD + NCKD), fully in log-space with one
# log-sum-exp per (masked) tensor; scalar result written to SMEM.
# ----------------------------------------------------------------------------
def _dkd_kernel(stu_ref, tea_ref, gt_ref, o_ref, *, alpha, beta, T, R):
    inv_T = 1.0 / T
    s = stu_ref[...].astype(jnp.float32) * inv_T
    t = tea_ref[...].astype(jnp.float32) * inv_T
    gt = gt_ref[...]                                   # (R, 1) int32
    Rr, C = s.shape

    cls_ids = jax.lax.broadcasted_iota(jnp.int32, (Rr, C), 1)
    gt_mask = (cls_ids == gt).astype(jnp.float32)

    def lse(z):                                        # (R, 1) log-sum-exp
        m = jnp.max(z, axis=-1, keepdims=True)
        return m + jnp.log(jnp.sum(jnp.exp(z - m), axis=-1, keepdims=True))

    s_gt = jnp.sum(s * gt_mask, axis=-1, keepdims=True)
    t_gt = jnp.sum(t * gt_mask, axis=-1, keepdims=True)
    s_nt = s - 1000.0 * gt_mask                        # target class masked out
    t_nt = t - 1000.0 * gt_mask

    L_s, L_t = lse(s), lse(t)
    L_s_nt, L_t_nt = lse(s_nt), lse(t_nt)

    # --- TCKD: binary (target vs non-target) KL, all in log-space ---
    log_q_gt = t_gt - L_t
    log_q_ot = L_t_nt - L_t
    log_p_gt = s_gt - L_s
    log_p_ot = L_s_nt - L_s
    tckd = jnp.sum(jnp.exp(log_q_gt) * (log_q_gt - log_p_gt)
                   + jnp.exp(log_q_ot) * (log_q_ot - log_p_ot))

    # --- NCKD: KL over non-target classes ---
    log_pt_nt = t_nt - L_t_nt
    log_ps_nt = s_nt - L_s_nt
    nckd = jnp.sum(jnp.exp(log_pt_nt) * (log_pt_nt - log_ps_nt))

    scale = (T * T) / R
    o_ref[0, 0] = (alpha * tckd + beta * nckd) * scale


def pallas_dkd_loss(stu_logits, tea_logits, gt_classes, alpha, beta, temperature):
    R, _ = stu_logits.shape
    out = pl.pallas_call(
        functools.partial(_dkd_kernel, alpha=float(alpha), beta=float(beta),
                          T=float(temperature), R=R),
        out_shape=jax.ShapeDtypeStruct((1, 1), jnp.float32),
        in_specs=[
            pl.BlockSpec(memory_space=pltpu.MemorySpace.VMEM),
            pl.BlockSpec(memory_space=pltpu.MemorySpace.VMEM),
            pl.BlockSpec(memory_space=pltpu.MemorySpace.VMEM),
        ],
        out_specs=pl.BlockSpec(memory_space=pltpu.MemorySpace.SMEM),
    )(stu_logits, tea_logits, gt_classes.reshape(R, 1).astype(jnp.int32))
    return out[0, 0]


# ----------------------------------------------------------------------------
# RCNNKD (DKD branch) in JAX, with Pallas kernels for the hot paths.
# ----------------------------------------------------------------------------
class RCNNKDPallas:
    def __init__(self, key, num_classes=8, c_stu=32, c_tea=64, pool=4):
        self.num_classes = num_classes
        self.pool = pool
        self.c_stu = c_stu
        self.c_tea = c_tea
        # DKD hyper-params (cfg.KD.DKD.*)
        self.alpha, self.beta, self.temperature = 1.0, 8.0, 4.0

        # pixel normalization buffers (per-channel, like register_buffer view(-1,1,1))
        self.pixel_mean = jnp.array([103.53, 116.28, 123.675], jnp.float32)
        self.pixel_std = jnp.array([1.0, 1.0, 1.0], jnp.float32)
        self.teacher_pixel_mean = jnp.array([123.675, 116.28, 103.53], jnp.float32)
        self.teacher_pixel_std = jnp.array([58.395, 57.12, 57.375], jnp.float32)
        self.input_format = "BGR"
        self.teacher_input_format = "RGB"

        ks = jax.random.split(key, 16)
        n_logit = num_classes + 1
        n_bbox = 4 * num_classes
        d_stu = c_stu * pool * pool
        d_tea = c_tea * pool * pool

        def init(k, shape, scale=0.05):
            return (scale * jax.random.normal(k, shape)).astype(jnp.float32)

        # student: backbone (1x1 conv), box_head (2 FC), box_predictor
        self.s_bb_w = init(ks[0], (3, c_stu))
        self.s_bb_b = init(ks[1], (c_stu,))
        self.s_fc1_w = init(ks[2], (d_stu, c_stu))
        self.s_fc1_b = init(ks[3], (c_stu,))
        self.s_fc2_w = init(ks[4], (c_stu, c_stu))
        self.s_fc2_b = init(ks[5], (c_stu,))
        self.s_cls_w = init(ks[6], (c_stu, n_logit))
        self.s_cls_b = init(ks[7], (n_logit,))
        self.s_box_w = init(ks[8], (c_stu, n_bbox))
        self.s_box_b = jnp.zeros((n_bbox,), jnp.float32)
        # teacher
        self.t_bb_w = init(ks[9], (3, c_tea))
        self.t_bb_b = init(ks[10], (c_tea,))
        self.t_fc1_w = init(ks[11], (d_tea, c_tea))
        self.t_fc1_b = init(ks[12], (c_tea,))
        self.t_fc2_w = init(ks[13], (c_tea, c_tea))
        self.t_fc2_b = init(ks[14], (c_tea,))
        self.t_cls_w = init(ks[15], (c_tea, n_logit))
        self.t_cls_b = jnp.zeros((n_logit,), jnp.float32)
        self.t_box_w = init(jax.random.fold_in(key, 99), (c_tea, n_bbox)) * 0.05
        self.t_box_b = jnp.zeros((n_bbox,), jnp.float32)

    # ---- fold (x - mean)/std (+ optional post-normalize channel permute, as in
    #      the spec's teacher_preprocess_image) into the 1x1-conv weight/bias ----
    @staticmethod
    def _fold_norm(w, b, mean, std, perm=None):
        if perm is not None:
            inv_perm = np.argsort(np.asarray(perm))
            w = w[jnp.asarray(inv_perm)]     # re-index conv rows by raw channel
        inv_std = 1.0 / std
        w_eff = w * inv_std[:, None]
        b_eff = b - (mean * inv_std) @ w
        return w_eff, b_eff

    # ---- forward (training, KD.TYPE == 'DKD' branch) ----
    def forward(self, images_nchw, proposal_boxes, gt_classes_per_image):
        B, C, H, W = images_nchw.shape
        P = self.pool

        # NCHW -> (B*H*W, C) pixel rows; normalize passes are folded into the
        # backbone weights, so the raw pixels feed the matmul directly.
        x2d = jnp.transpose(images_nchw, (0, 2, 3, 1)).reshape(B * H * W, C)
        x2d = x2d.astype(jnp.float32)

        s_w, s_b = self._fold_norm(self.s_bb_w, self.s_bb_b,
                                   self.pixel_mean, self.pixel_std)
        flip = self.input_format != self.teacher_input_format
        t_w, t_b = self._fold_norm(self.t_bb_w, self.t_bb_b,
                                   self.teacher_pixel_mean, self.teacher_pixel_std,
                                   perm=[2, 1, 0] if flip else None)

        s_feat = pallas_linear(x2d, s_w, s_b, relu=True).reshape(B, H, W, self.c_stu)
        t_feat = pallas_linear(x2d, t_w, t_b, relu=True).reshape(B, H, W, self.c_tea)

        # box table (batch, y0, x0) stays on device: no host ints, no retrace.
        boxes = jnp.asarray(proposal_boxes, jnp.int32).reshape(B, -1, 2)
        r_per = boxes.shape[1]
        batch_ix = jnp.repeat(jnp.arange(B, dtype=jnp.int32), r_per)[:, None]
        box_tbl = jnp.concatenate([batch_ix, boxes.reshape(-1, 2)], axis=1)

        s_pooled = pallas_roi_pool(s_feat, box_tbl, P)
        t_pooled = pallas_roi_pool(t_feat, box_tbl, P)

        stu_logits, stu_bbox = pallas_roi_head(
            s_pooled, self.s_fc1_w, self.s_fc1_b, self.s_fc2_w, self.s_fc2_b,
            self.s_cls_w, self.s_cls_b, self.s_box_w, self.s_box_b)
        tea_logits, tea_bbox = pallas_roi_head(
            t_pooled, self.t_fc1_w, self.t_fc1_b, self.t_fc2_w, self.t_fc2_b,
            self.t_cls_w, self.t_cls_b, self.t_box_w, self.t_box_b)

        # rcnn_dkd_loss: gt_classes = cat(gt_classes).reshape(-1)
        gt_classes = jnp.concatenate(
            [jnp.asarray(g).reshape(-1) for g in gt_classes_per_image], axis=0)
        loss_dkd = pallas_dkd_loss(stu_logits, tea_logits, gt_classes,
                                   self.alpha, self.beta, self.temperature)

        # TODO(synk): detector_losses / proposal_losses from roi_heads & RPN are
        #             not reproducible without detectron2 internals.
        return {"loss_dkd": loss_dkd}


# ----------------------------------------------------------------------------
if __name__ == "__main__":
    key = jax.random.PRNGKey(0)
    k_img, k_box, k_gt, k_param = jax.random.split(key, 4)

    B, C, H, W = 2, 3, 16, 16
    R_per_img, num_classes, pool = 8, 8, 4

    # image batch in NCHW (PyTorch convention)
    images = jax.random.uniform(k_img, (B, C, H, W), jnp.float32, 0.0, 255.0)

    # integer-aligned proposal boxes (y0, x0), pool-size crops, on-device
    proposal_boxes = jax.random.randint(
        k_box, (B, R_per_img, 2), 0, H - pool + 1, dtype=jnp.int32)

    # gt classes per image in [0, num_classes] (num_classes == background)
    gt_classes_per_image = [
        jax.random.randint(jax.random.fold_in(k_gt, i), (R_per_img,), 0,
                           num_classes + 1)
        for i in range(B)
    ]

    model = RCNNKDPallas(k_param, num_classes=num_classes, pool=pool)
    losses = model.forward(images, proposal_boxes, gt_classes_per_image)
    loss = jax.block_until_ready(losses["loss_dkd"])
    assert jnp.isfinite(loss)
    print("KERNEL_OK")
</pallas_src>

<mosaic_0001>
module attributes {stable_mosaic.version = 11 : i64} {
  func.func @_linear_kernel(%arg0: i32, %arg1: memref<512x3xf32, #tpu.memory_space<vmem>>, %arg2: memref<3x32xf32, #tpu.memory_space<vmem>>, %arg3: memref<1x32xf32, #tpu.memory_space<vmem>>, %arg4: memref<512x32xf32, #tpu.memory_space<vmem>>) attributes {dimension_semantics = [#tpu.dimension_semantics<parallel>], iteration_bounds = array<i64: 1>, scalar_prefetch = 0 : i64, scratch_operands = 0 : i64, tpu.core_type = #tpu.core_type<tc>, window_params = [{transform_indices = @transform_0, window_bounds = array<i64: 512, 3>}, {pipeline_mode = #tpu.pipeline_mode<synchronous>, transform_indices = @transform_1, window_bounds = array<i64: 3, 32>}, {pipeline_mode = #tpu.pipeline_mode<synchronous>, transform_indices = @transform_2, window_bounds = array<i64: 1, 32>}, {transform_indices = @transform_3, window_bounds = array<i64: 512, 32>}]} {
    %c0 = arith.constant 0 : index
    %c0_0 = arith.constant 0 : index
    %0 = vector.load %arg1[%c0, %c0_0] : memref<512x3xf32, #tpu.memory_space<vmem>>, vector<512x3xf32>
    %c0_1 = arith.constant 0 : index
    %c0_2 = arith.constant 0 : index
    %1 = vector.load %arg2[%c0_1, %c0_2] : memref<3x32xf32, #tpu.memory_space<vmem>>, vector<3x32xf32>
    %cst = arith.constant dense<0.000000e+00> : vector<512x32xf32>
    %2 = tpu.matmul %0, %1, %cst {dimension_numbers = #tpu.dot_dimension_numbers<[1], [0], [0], [1], [0, 0, 1, 1], [], []>} : vector<512x3xf32>, vector<3x32xf32>, vector<512x32xf32> -> vector<512x32xf32>
    %c0_3 = arith.constant 0 : index
    %c0_4 = arith.constant 0 : index
    %3 = vector.load %arg3[%c0_3, %c0_4] : memref<1x32xf32, #tpu.memory_space<vmem>>, vector<1x32xf32>
    %4 = vector.broadcast %3 : vector<1x32xf32> to vector<512x32xf32>
    %5 = arith.addf %2, %4 : vector<512x32xf32>
    %cst_5 = arith.constant 0.000000e+00 : f32
    %6 = vector.broadcast %cst_5 : f32 to vector<512x32xf32>
    %7 = arith.maximumf %5, %6 : vector<512x32xf32>
    %c0_6 = arith.constant 0 : index
    %c0_7 = arith.constant 0 : index
    %8 = vector.load %arg4[%c0_6, %c0_7] : memref<512x32xf32, #tpu.memory_space<vmem>>, vector<512x32xf32>
    tpu.vector_store %arg4[%c0_6, %c0_7], %7 {strides = array<i32>} : memref<512x32xf32, #tpu.memory_space<vmem>>, vector<512x32xf32>,
    return
  }
  func.func @transform_0(%arg0: i32) -> (i32, i32) {
    %c0_i32 = arith.constant 0 : i32
    %c0_i32_0 = arith.constant 0 : i32
    return %arg0, %c0_i32 : i32, i32
  }
  func.func @transform_1(%arg0: i32) -> (i32, i32) {
    %c0_i32 = arith.constant 0 : i32
    %c0_i32_0 = arith.constant 0 : i32
    %c0_i32_1 = arith.constant 0 : i32
    return %c0_i32, %c0_i32_0 : i32, i32
  }
  func.func @transform_2(%arg0: i32) -> (i32, i32) {
    %c0_i32 = arith.constant 0 : i32
    %c0_i32_0 = arith.constant 0 : i32
    %c0_i32_1 = arith.constant 0 : i32
    return %c0_i32, %c0_i32_0 : i32, i32
  }
  func.func @transform_3(%arg0: i32) -> (i32, i32) {
    %c0_i32 = arith.constant 0 : i32
    %c0_i32_0 = arith.constant 0 : i32
    return %arg0, %c0_i32 : i32, i32
  }
}

</mosaic_0001>

<bundles_post_ra>
// kernel: tpu_custom_call.1
= control target key start
LH: loop header
LB: loop body
LE: loop exit
PB: predicated region body
PF: predicated region fallthrough
CT: control target
= control target key end

     0   :  { %vm279_vm0 = vcmask 1042432   ;;  %vm86_vm1 = vcmask 23552   ;;  %vm732_vm2 = vcmask 261120   ;;  %s1636_s1 = inlined_call_operand.vmem [shape: f32[3,32], index: 1, kind: input, shape index: {}]   ;;  %s1637_s0 = inlined_call_operand.vmem [shape: f32[512,3], index: 0, kind: input, shape index: {}]   ;;  %s1638_s2 = inlined_call_operand.vmem [shape: f32[1,32], index: 2, kind: input, shape index: {}]   ;;  %s1639_s3 = inlined_call_operand.vmem [shape: f32[512,32], index: 3, kind: output, shape index: {}]  }
   0x1   :  { %v78_v0 = vld [vmem:[%s1636_s1] sm:$0x7]  ;;  %v15_v3 = vld [vmem:[%s1637_s0 + $0x8] sm:$0xff]  ;;  %v16_v5 = vld [vmem:[%s1637_s0 + $0x10] sm:$0xff] }
   0x2   :  { %v14_v1 = vld [vmem:[%s1637_s0] sm:$0xff]  ;;  %932 = vmatprep.subr.msk.mxu0 %vm279_vm0, %v78_v0  ;;  %1030 = vmatprep.subr.msk.mxu1 %vm279_vm0, %v78_v0  ;;  %v47_v4 = vld [vmem:[%s1637_s0 + $0x108] sm:$0xff]  ;;  %v48_v6 = vld [vmem:[%s1637_s0 + $0x110] sm:$0xff] }
   0x3   :  { %v46_v2 = vld [vmem:[%s1637_s0 + $0x100] sm:$0xff]  ;;  %933 = vmatpush3.msk.msra.mxu0 %vm279_vm0, %v78_v0  ;;  %1031 = vmatpush3.msk.msra.mxu1 %vm279_vm0, %v78_v0  ;;  %v17_v7 = vld [vmem:[%s1637_s0 + $0x18] sm:$0xff]  ;;  %v19_v11 = vld [vmem:[%s1637_s0 + $0x28] sm:$0xff] }
   0x4   :  { %934 = vmatprep.mubr.msk.f32.mxu0 %vm86_vm1, %v14_v1  ;;  %982 = vmatprep.mubr.msk.f32.mxu1 %vm86_vm1, %v46_v2  ;;  %v49_v8 = vld [vmem:[%s1637_s0 + $0x118] sm:$0xff]  ;;  %v18_v9 = vld [vmem:[%s1637_s0 + $0x20] sm:$0xff]  ;;  %v51_v12 = vld [vmem:[%s1637_s0 + $0x128] sm:$0xff] }
   0x5   :  { %935 = vmatmul.mubr.msk.f32.vlgmr.msra.gmra.mrb[0].mxu0 %vm86_vm1, %v15_v3  ;;  %983 = vmatmul.mubr.msk.f32.vlgmr.msra.gmra.mrb[0].mxu1 %vm86_vm1, %v47_v4  ;;  %v50_v10 = vld [vmem:[%s1637_s0 + $0x120] sm:$0xff]  ;;  %v20_v13 = vld [vmem:[%s1637_s0 + $0x30] sm:$0xff]  ;;  %v21_v15 = vld [vmem:[%s1637_s0 + $0x38] sm:$0xff] }
   0x6   :  { %937 = vmatprep.mubr.msk.f32.mxu0 %vm86_vm1, %v16_v5  ;;  %985 = vmatprep.mubr.msk.f32.mxu1 %vm86_vm1, %v48_v6  ;;  %v52_v14 = vld [vmem:[%s1637_s0 + $0x130] sm:$0xff]  ;;  %v53_v16 = vld [vmem:[%s1637_s0 + $0x138] sm:$0xff]  ;;  %v22_v17 = vld [vmem:[%s1637_s0 + $0x40] sm:$0xff] }
   0x7   :  { %v54_v18 = vld [vmem:[%s1637_s0 + $0x140] sm:$0xff]  ;;  %v23_v19 = vld [vmem:[%s1637_s0 + $0x48] sm:$0xff]  ;;  %v24_v21 = vld [vmem:[%s1637_s0 + $0x50] sm:$0xff] }
   0x8   :  { %v55_v20 = vld [vmem:[%s1637_s0 + $0x148] sm:$0xff]  ;;  %v56_v22 = vld [vmem:[%s1637_s0 + $0x150] sm:$0xff]  ;;  %v25_v23 = vld [vmem:[%s1637_s0 + $0x58] sm:$0xff] }
   0x9   :  { %938 = vmatmul.mubr.msk.f32.gmra.mrb[2].mxu0 %vm86_vm1, %v17_v7  ;;  %986 = vmatmul.mubr.msk.f32.gmra.mrb[2].mxu1 %vm86_vm1, %v49_v8  ;;  %v57_v24 = vld [vmem:[%s1637_s0 + $0x158] sm:$0xff]  ;;  %v26_v25 = vld [vmem:[%s1637_s0 + $0x60] sm:$0xff]  ;;  %v27_v27 = vld [vmem:[%s1637_s0 + $0x68] sm:$0xff] }
   0xa   :  { %940 = vmatprep.mubr.msk.f32.mxu0 %vm86_vm1, %v18_v9  ;;  %988 = vmatprep.mubr.msk.f32.mxu1 %vm86_vm1, %v50_v10  ;;  %v58_v26 = vld [vmem:[%s1637_s0 + $0x160] sm:$0xff]  ;;  %v59_v28 = vld [vmem:[%s1637_s0 + $0x168] sm:$0xff]  ;;  %v28_v29 = vld [vmem:[%s1637_s0 + $0x70] sm:$0xff] }
   0xb   :  { %v60_v30 = vld [vmem:[%s1637_s0 + $0x170] sm:$0xff]  ;;  %v29_v31 = vld [vmem:[%s1637_s0 + $0x78] sm:$0xff]  ;;  %v30_v33 = vld [vmem:[%s1637_s0 + $0x80] sm:$0xff] }
   0xc   :  { %v61_v32 = vld [vmem:[%s1637_s0 + $0x178] sm:$0xff]  ;;  %v62_v34 = vld [vmem:[%s1637_s0 + $0x180] sm:$0xff]  ;;  %v31_v35 = vld [vmem:[%s1637_s0 + $0x88] sm:$0xff] }
   0xd   :  { %941 = vmatmul.mubr.msk.f32.gmra.mrb[4].mxu0 %vm86_vm1, %v19_v11  ;;  %989 = vmatmul.mubr.msk.f32.gmra.mrb[4].mxu1 %vm86_vm1, %v51_v12  ;;  %v63_v36 = vld [vmem:[%s1637_s0 + $0x188] sm:$0xff]  ;;  %v32_v37 = vld [vmem:[%s1637_s0 + $0x90] sm:$0xff]  ;;  %v33_v39 = vld [vmem:[%s1637_s0 + $0x98] sm:$0xff] }
   0xe   :  { %943 = vmatprep.mubr.msk.f32.mxu0 %vm86_vm1, %v20_v13  ;;  %991 = vmatprep.mubr.msk.f32.mxu1 %vm86_vm1, %v52_v14  ;;  %v64_v38 = vld [vmem:[%s1637_s0 + $0x190] sm:$0xff]  ;;  %v65_v40 = vld [vmem:[%s1637_s0 + $0x198] sm:$0xff]  ;;  %v34_v41 = vld [vmem:[%s1637_s0 + $0xa0] sm:$0xff] }
   0xf   :  { %v66_v42 = vld [vmem:[%s1637_s0 + $0x1a0] sm:$0xff]  ;;  %v35_v43 = vld [vmem:[%s1637_s0 + $0xa8] sm:$0xff]  ;;  %v36_v45 = vld [vmem:[%s1637_s0 + $0xb0] sm:$0xff] }
  0x10   :  { %v67_v44 = vld [vmem:[%s1637_s0 + $0x1a8] sm:$0xff]  ;;  %v68_v46 = vld [vmem:[%s1637_s0 + $0x1b0] sm:$0xff]  ;;  %v37_v47 = vld [vmem:[%s1637_s0 + $0xb8] sm:$0xff] }
  0x11   :  { %944 = vmatmul.mubr.msk.f32.gmra.mrb[6].mxu0 %vm86_vm1, %v21_v15  ;;  %992 = vmatmul.mubr.msk.f32.gmra.mrb[6].mxu1 %vm86_vm1, %v53_v16  ;;  %v69_v48 = vld [vmem:[%s1637_s0 + $0x1b8] sm:$0xff]  ;;  %v38_v49 = vld [vmem:[%s1637_s0 + $0xc0] sm:$0xff]  ;;  %v39_v51 = vld [vmem:[%s1637_s0 + $0xc8] sm:$0xff] }
  0x12   :  { %946 = vmatprep.mubr.msk.f32.mxu0 %vm86_vm1, %v22_v17  ;;  %994 = vmatprep.mubr.msk.f32.mxu1 %vm86_vm1, %v54_v18  ;;  %v70_v50 = vld [vmem:[%s1637_s0 + $0x1c0] sm:$0xff]  ;;  %v71_v52 = vld [vmem:[%s1637_s0 + $0x1c8] sm:$0xff]  ;;  %v40_v53 = vld [vmem:[%s1637_s0 + $0xd0] sm:$0xff] }
  0x13   :  { %v72_v54 = vld [vmem:[%s1637_s0 + $0x1d0] sm:$0xff]  ;;  %v41_v55 = vld [vmem:[%s1637_s0 + $0xd8] sm:$0xff]  ;;  %v42_v57 = vld [vmem:[%s1637_s0 + $0xe0] sm:$0xff] }
  0x14   :  { %v73_v56 = vld [vmem:[%s1637_s0 + $0x1d8] sm:$0xff]  ;;  %v74_v58 = vld [vmem:[%s1637_s0 + $0x1e0] sm:$0xff]  ;;  %v43_v59 = vld [vmem:[%s1637_s0 + $0xe8] sm:$0xff] }
  0x15   :  { %947 = vmatmul.mubr.msk.f32.gmra.mrb[8].mxu0 %vm86_vm1, %v23_v19  ;;  %995 = vmatmul.mubr.msk.f32.gmra.mrb[8].mxu1 %vm86_vm1, %v55_v20  ;;  %v75_v60 = vld [vmem:[%s1637_s0 + $0x1e8] sm:$0xff]  ;;  %v44_v61 = vld [vmem:[%s1637_s0 + $0xf0] sm:$0xff]  ;;  %v45_v63 = vld [vmem:[%s1637_s0 + $0xf8] sm:$0xff] }
  0x16   :  { %949 = vmatprep.mubr.msk.f32.mxu0 %vm86_vm1, %v24_v21  ;;  %997 = vmatprep.mubr.msk.f32.mxu1 %vm86_vm1, %v56_v22  ;;  %v76_v62 = vld [vmem:[%s1637_s0 + $0x1f0] sm:$0xff]  ;;  %v77_v0 = vld [vmem:[%s1637_s0 + $0x1f8] sm:$0xff]  ;;  %v1314_v1 = vld [vmem:[%s1638_s2] ss:$0 sm:$0xff] }
  0x19   :  { %950 = vmatmul.mubr.msk.f32.gmra.mrb[10].mxu0 %vm86_vm1, %v25_v23  ;;  %998 = vmatmul.mubr.msk.f32.gmra.mrb[10].mxu1 %vm86_vm1, %v57_v24 }
  0x1a   :  { %952 = vmatprep.mubr.msk.f32.mxu0 %vm86_vm1, %v26_v25  ;;  %1000 = vmatprep.mubr.msk.f32.mxu1 %vm86_vm1, %v58_v26 }
  0x1d   :  { %953 = vmatmul.mubr.msk.f32.gmra.mrb[12].mxu0 %vm86_vm1, %v27_v27  ;;  %1001 = vmatmul.mubr.msk.f32.gmra.mrb[12].mxu1 %vm86_vm1, %v59_v28 }
  0x1e   :  { %955 = vmatprep.mubr.msk.f32.mxu0 %vm86_vm1, %v28_v29  ;;  %1003 = vmatprep.mubr.msk.f32.mxu1 %vm86_vm1, %v60_v30 }
  0x21   :  { %956 = vmatmul.mubr.msk.f32.gmra.mrb[14].mxu0 %vm86_vm1, %v29_v31  ;;  %1004 = vmatmul.mubr.msk.f32.gmra.mrb[14].mxu1 %vm86_vm1, %v61_v32 }
  0x22   :  { %958 = vmatprep.mubr.msk.f32.mxu0 %vm86_vm1, %v30_v33  ;;  %1006 = vmatprep.mubr.msk.f32.mxu1 %vm86_vm1, %v62_v34 }
  0x25   :  { %959 = vmatmul.mubr.msk.f32.gmra.mrb[16].mxu0 %vm86_vm1, %v31_v35  ;;  %1007 = vmatmul.mubr.msk.f32.gmra.mrb[16].mxu1 %vm86_vm1, %v63_v36 }
  0x26   :  { %961 = vmatprep.mubr.msk.f32.mxu0 %vm86_vm1, %v32_v37  ;;  %1009 = vmatprep.mubr.msk.f32.mxu1 %vm86_vm1, %v64_v38 }
  0x29   :  { %962 = vmatmul.mubr.msk.f32.gmra.mrb[18].mxu0 %vm86_vm1, %v33_v39  ;;  %1010 = vmatmul.mubr.msk.f32.gmra.mrb[18].mxu1 %vm86_vm1, %v65_v40 }
  0x2a   :  { %964 = vmatprep.mubr.msk.f32.mxu0 %vm86_vm1, %v34_v41  ;;  %1012 = vmatprep.mubr.msk.f32.mxu1 %vm86_vm1, %v66_v42 }
  0x2d   :  { %965 = vmatmul.mubr.msk.f32.gmra.mrb[20].mxu0 %vm86_vm1, %v35_v43  ;;  %1013 = vmatmul.mubr.msk.f32.gmra.mrb[20].mxu1 %vm86_vm1, %v67_v44 }
  0x2e   :  { %967 = vmatprep.mubr.msk.f32.mxu0 %vm86_vm1, %v36_v45  ;;  %1015 = vmatprep.mubr.msk.f32.mxu1 %vm86_vm1, %v68_v46 }
  0x31   :  { %968 = vmatmul.mubr.msk.f32.gmra.mrb[22].mxu0 %vm86_vm1, %v37_v47  ;;  %1016 = vmatmul.mubr.msk.f32.gmra.mrb[22].mxu1 %vm86_vm1, %v69_v48 }
  0x32   :  { %970 = vmatprep.mubr.msk.f32.mxu0 %vm86_vm1, %v38_v49  ;;  %1018 = vmatprep.mubr.msk.f32.mxu1 %vm86_vm1, %v70_v50 }
  0x35   :  { %971 = vmatmul.mubr.msk.f32.gmra.mrb[24].mxu0 %vm86_vm1, %v39_v51  ;;  %1019 = vmatmul.mubr.msk.f32.gmra.mrb[24].mxu1 %vm86_vm1, %v71_v52 }
  0x36   :  { %973 = vmatprep.mubr.msk.f32.mxu0 %vm86_vm1, %v40_v53  ;;  %1021 = vmatprep.mubr.msk.f32.mxu1 %vm86_vm1, %v72_v54 }
  0x39   :  { %974 = vmatmul.mubr.msk.f32.gmra.mrb[26].mxu0 %vm86_vm1, %v41_v55  ;;  %1022 = vmatmul.mubr.msk.f32.gmra.mrb[26].mxu1 %vm86_vm1, %v73_v56 }
  0x3a   :  { %976 = vmatprep.mubr.msk.f32.mxu0 %vm86_vm1, %v42_v57  ;;  %1024 = vmatprep.mubr.msk.f32.mxu1 %vm86_vm1, %v74_v58 }
  0x3d   :  { %977 = vmatmul.mubr.msk.f32.gmra.mrb[28].mxu0 %vm86_vm1, %v43_v59  ;;  %1025 = vmatmul.mubr.msk.f32.gmra.mrb[28].mxu1 %vm86_vm1, %v75_v60 }
  0x3e   :  { %979 = vmatprep.mubr.msk.f32.mxu0 %vm86_vm1, %v44_v61  ;;  %1027 = vmatprep.mubr.msk.f32.mxu1 %vm86_vm1, %v76_v62 }
  0x41   :  { %980 = vmatmul.mubr.msk.f32.gmra.mrb[30].mxu0 %vm86_vm1, %v45_v63  ;;  %1028 = vmatmul.mubr.msk.f32.gmra.mrb[30].mxu1 %vm86_vm1, %v77_v0 }
  0xd8   :  { %v936_v2 = vpop.f32.mrb[0].mxu0  ;;  %v984_v3 = vpop.f32.mrb[0].mxu1 }
  0xd9   :  { %v355_v4 = vadd.f32 %v936_v2, %v1314_v1  ;;  %v515_v5 = vadd.f32 %v984_v3, %v1314_v1  ;;  %v349_v6 = vpop.f32.mrb[1].mxu0  ;;  %v509_v7 = vpop.f32.mrb[1].mxu1 }
  0xda   :  { %v350_v8 = vadd.f32 %v1314_v1, %v349_v6  ;;  %v510_v9 = vadd.f32 %v1314_v1, %v509_v7 }
  0xdb   :  { %v669_v10 = vmax.f32 %v355_v4, 0.0  ;;  %v701_v11 = vmax.f32 %v515_v5, 0.0 }
  0xdc   :  { %v668_v12 = vmax.f32 %v350_v8, 0.0  ;;  %v700_v13 = vmax.f32 %v510_v9, 0.0  ;;  %v939_v14 = vpop.f32.mrb[2].mxu0  ;;  %v987_v15 = vpop.f32.mrb[2].mxu1 }
  0xdd   :  { %734 = vst.msk [vmem:[%s1639_s3 + $0x8] sm:$0xff] %vm732_vm2, %v669_v10  ;;  %766 = vst.msk [vmem:[%s1639_s3 + $0x108] sm:$0xff] %vm732_vm2, %v701_v11  ;;  %v365_v16 = vadd.f32 %v939_v14, %v1314_v1  ;;  %v525_v17 = vadd.f32 %v987_v15, %v1314_v1  ;;  %v359_v18 = vpop.f32.mrb[3].mxu0  ;;  %v519_v19 = vpop.f32.mrb[3].mxu1 }
  0xde   :  { %733 = vst.msk [vmem:[%s1639_s3] sm:$0xff] %vm732_vm2, %v668_v12  ;;  %765 = vst.msk [vmem:[%s1639_s3 + $0x100] sm:$0xff] %vm732_vm2, %v700_v13  ;;  %v360_v20 = vadd.f32 %v1314_v1, %v359_v18  ;;  %v520_v21 = vadd.f32 %v1314_v1, %v519_v19 }
  0xdf   :  { %v671_v22 = vmax.f32 %v365_v16, 0.0  ;;  %v703_v23 = vmax.f32 %v525_v17, 0.0 }
  0xe0   :  { %v670_v24 = vmax.f32 %v360_v20, 0.0  ;;  %v702_v25 = vmax.f32 %v520_v21, 0.0  ;;  %v942_v26 = vpop.f32.mrb[4].mxu0  ;;  %v990_v27 = vpop.f32.mrb[4].mxu1 }
  0xe1   :  { %736 = vst.msk [vmem:[%s1639_s3 + $0x18] sm:$0xff] %vm732_vm2, %v671_v22  ;;  %768 = vst.msk [vmem:[%s1639_s3 + $0x118] sm:$0xff] %vm732_vm2, %v703_v23  ;;  %v375_v28 = vadd.f32 %v942_v26, %v1314_v1  ;;  %v535_v29 = vadd.f32 %v990_v27, %v1314_v1  ;;  %v369_v30 = vpop.f32.mrb[5].mxu0  ;;  %v529_v31 = vpop.f32.mrb[5].mxu1 }
  0xe2   :  { %735 = vst.msk [vmem:[%s1639_s3 + $0x10] sm:$0xff] %vm732_vm2, %v670_v24  ;;  %767 = vst.msk [vmem:[%s1639_s3 + $0x110] sm:$0xff] %vm732_vm2, %v702_v25  ;;  %v370_v32 = vadd.f32 %v1314_v1, %v369_v30  ;;  %v530_v33 = vadd.f32 %v1314_v1, %v529_v31 }
  0xe3   :  { %v673_v34 = vmax.f32 %v375_v28, 0.0  ;;  %v705_v35 = vmax.f32 %v535_v29, 0.0 }
  0xe4   :  { %v672_v36 = vmax.f32 %v370_v32, 0.0  ;;  %v704_v37 = vmax.f32 %v530_v33, 0.0  ;;  %v945_v38 = vpop.f32.mrb[6].mxu0  ;;  %v993_v39 = vpop.f32.mrb[6].mxu1 }
  0xe5   :  { %738 = vst.msk [vmem:[%s1639_s3 + $0x28] sm:$0xff] %vm732_vm2, %v673_v34  ;;  %770 = vst.msk [vmem:[%s1639_s3 + $0x128] sm:$0xff] %vm732_vm2, %v705_v35  ;;  %v385_v40 = vadd.f32 %v945_v38, %v1314_v1  ;;  %v545_v41 = vadd.f32 %v993_v39, %v1314_v1  ;;  %v379_v42 = vpop.f32.mrb[7].mxu0  ;;  %v539_v43 = vpop.f32.mrb[7].mxu1 }
  0xe6   :  { %737 = vst.msk [vmem:[%s1639_s3 + $0x20] sm:$0xff] %vm732_vm2, %v672_v36  ;;  %769 = vst.msk [vmem:[%s1639_s3 + $0x120] sm:$0xff] %vm732_vm2, %v704_v37  ;;  %v380_v44 = vadd.f32 %v1314_v1, %v379_v42  ;;  %v540_v45 = vadd.f32 %v1314_v1, %v539_v43 }
  0xe7   :  { %v675_v46 = vmax.f32 %v385_v40, 0.0  ;;  %v707_v47 = vmax.f32 %v545_v41, 0.0 }
  0xe8   :  { %v674_v48 = vmax.f32 %v380_v44, 0.0  ;;  %v706_v49 = vmax.f32 %v540_v45, 0.0  ;;  %v948_v50 = vpop.f32.mrb[8].mxu0  ;;  %v996_v51 = vpop.f32.mrb[8].mxu1 }
  0xe9   :  { %740 = vst.msk [vmem:[%s1639_s3 + $0x38] sm:$0xff] %vm732_vm2, %v675_v46  ;;  %772 = vst.msk [vmem:[%s1639_s3 + $0x138] sm:$0xff] %vm732_vm2, %v707_v47  ;;  %v395_v52 = vadd.f32 %v948_v50, %v1314_v1  ;;  %v555_v53 = vadd.f32 %v996_v51, %v1314_v1  ;;  %v389_v54 = vpop.f32.mrb[9].mxu0  ;;  %v549_v55 = vpop.f32.mrb[9].mxu1 }
  0xea   :  { %739 = vst.msk [vmem:[%s1639_s3 + $0x30] sm:$0xff] %vm732_vm2, %v674_v48  ;;  %771 = vst.msk [vmem:[%s1639_s3 + $0x130] sm:$0xff] %vm732_vm2, %v706_v49  ;;  %v390_v56 = vadd.f32 %v1314_v1, %v389_v54  ;;  %v550_v57 = vadd.f32 %v1314_v1, %v549_v55 }
  0xeb   :  { %v677_v58 = vmax.f32 %v395_v52, 0.0  ;;  %v709_v59 = vmax.f32 %v555_v53, 0.0 }
  0xec   :  { %v676_v60 = vmax.f32 %v390_v56, 0.0  ;;  %v708_v61 = vmax.f32 %v550_v57, 0.0  ;;  %v951_v62 = vpop.f32.mrb[10].mxu0  ;;  %v999_v63 = vpop.f32.mrb[10].mxu1 }
  0xed   :  { %742 = vst.msk [vmem:[%s1639_s3 + $0x48] sm:$0xff] %vm732_vm2, %v677_v58  ;;  %774 = vst.msk [vmem:[%s1639_s3 + $0x148] sm:$0xff] %vm732_vm2, %v709_v59  ;;  %v405_v0 = vadd.f32 %v951_v62, %v1314_v1  ;;  %v565_v2 = vadd.f32 %v999_v63, %v1314_v1  ;;  %v399_v3 = vpop.f32.mrb[11].mxu0  ;;  %v559_v4 = vpop.f32.mrb[11].mxu1 }
  0xee   :  { %741 = vst.msk [vmem:[%s1639_s3 + $0x40] sm:$0xff] %vm732_vm2, %v676_v60  ;;  %773 = vst.msk [vmem:[%s1639_s3 + $0x140] sm:$0xff] %vm732_vm2, %v708_v61  ;;  %v400_v5 = vadd.f32 %v1314_v1, %v399_v3  ;;  %v560_v6 = vadd.f32 %v1314_v1, %v559_v4 }
  0xef   :  { %v679_v7 = vmax.f32 %v405_v0, 0.0  ;;  %v711_v8 = vmax.f32 %v565_v2, 0.0 }
  0xf0   :  { %v678_v9 = vmax.f32 %v400_v5, 0.0  ;;  %v710_v10 = vmax.f32 %v560_v6, 0.0  ;;  %v954_v11 = vpop.f32.mrb[12].mxu0  ;;  %v1002_v12 = vpop.f32.mrb[12].mxu1 }
  0xf1   :  { %744 = vst.msk [vmem:[%s1639_s3 + $0x58] sm:$0xff] %vm732_vm2, %v679_v7  ;;  %776 = vst.msk [vmem:[%s1639_s3 + $0x158] sm:$0xff] %vm732_vm2, %v711_v8  ;;  %v415_v13 = vadd.f32 %v954_v11, %v1314_v1  ;;  %v575_v14 = vadd.f32 %v1002_v12, %v1314_v1  ;;  %v409_v15 = vpop.f32.mrb[13].mxu0  ;;  %v569_v16 = vpop.f32.mrb[13].mxu1 }
  0xf2   :  { %743 = vst.msk [vmem:[%s1639_s3 + $0x50] sm:$0xff] %vm732_vm2, %v678_v9  ;;  %775 = vst.msk [vmem:[%s1639_s3 + $0x150] sm:$0xff] %vm732_vm2, %v710_v10  ;;  %v410_v17 = vadd.f32 %v1314_v1, %v409_v15  ;;  %v570_v18 = vadd.f32 %v1314_v1, %v569_v16 }
  0xf3   :  { %v681_v19 = vmax.f32 %v415_v13, 0.0  ;;  %v713_v20 = vmax.f32 %v575_v14, 0.0 }
  0xf4   :  { %v680_v21 = vmax.f32 %v410_v17, 0.0  ;;  %v712_v22 = vmax.f32 %v570_v18, 0.0  ;;  %v957_v23 = vpop.f32.mrb[14].mxu0  ;;  %v1005_v24 = vpop.f32.mrb[14].mxu1 }
  0xf5   :  { %746 = vst.msk [vmem:[%s1639_s3 + $0x68] sm:$0xff] %vm732_vm2, %v681_v19  ;;  %778 = vst.msk [vmem:[%s1639_s3 + $0x168] sm:$0xff] %vm732_vm2, %v713_v20  ;;  %v425_v25 = vadd.f32 %v957_v23, %v1314_v1  ;;  %v585_v26 = vadd.f32 %v1005_v24, %v1314_v1  ;;  %v419_v27 = vpop.f32.mrb[15].mxu0  ;;  %v579_v28 = vpop.f32.mrb[15].mxu1 }
  0xf6   :  { %745 = vst.msk [vmem:[%s1639_s3 + $0x60] sm:$0xff] %vm732_vm2, %v680_v21  ;;  %777 = vst.msk [vmem:[%s1639_s3 + $0x160] sm:$0xff] %vm732_vm2, %v712_v22  ;;  %v420_v29 = vadd.f32 %v1314_v1, %v419_v27  ;;  %v580_v30 = vadd.f32 %v1314_v1, %v579_v28 }
  0xf7   :  { %v683_v31 = vmax.f32 %v425_v25, 0.0  ;;  %v715_v32 = vmax.f32 %v585_v26, 0.0 }
  0xf8   :  { %v682_v33 = vmax.f32 %v420_v29, 0.0  ;;  %v714_v34 = vmax.f32 %v580_v30, 0.0  ;;  %v960_v35 = vpop.f32.mrb[16].mxu0  ;;  %v1008_v36 = vpop.f32.mrb[16].mxu1 }
  0xf9   :  { %748 = vst.msk [vmem:[%s1639_s3 + $0x78] sm:$0xff] %vm732_vm2, %v683_v31  ;;  %780 = vst.msk [vmem:[%s1639_s3 + $0x178] sm:$0xff] %vm732_vm2, %v715_v32  ;;  %v435_v37 = vadd.f32 %v960_v35, %v1314_v1  ;;  %v595_v38 = vadd.f32 %v1008_v36, %v1314_v1  ;;  %v429_v39 = vpop.f32.mrb[17].mxu0  ;;  %v589_v40 = vpop.f32.mrb[17].mxu1 }
  0xfa   :  { %747 = vst.msk [vmem:[%s1639_s3 + $0x70] sm:$0xff] %vm732_vm2, %v682_v33  ;;  %779 = vst.msk [vmem:[%s1639_s3 + $0x170] sm:$0xff] %vm732_vm2, %v714_v34  ;;  %v430_v41 = vadd.f32 %v1314_v1, %v429_v39  ;;  %v590_v42 = vadd.f32 %v1314_v1, %v589_v40 }
  0xfb   :  { %v685_v43 = vmax.f32 %v435_v37, 0.0  ;;  %v717_v44 = vmax.f32 %v595_v38, 0.0 }
  0xfc   :  { %v684_v45 = vmax.f32 %v430_v41, 0.0  ;;  %v716_v46 = vmax.f32 %v590_v42, 0.0  ;;  %v963_v47 = vpop.f32.mrb[18].mxu0  ;;  %v1011_v48 = vpop.f32.mrb[18].mxu1 }
  0xfd   :  { %750 = vst.msk [vmem:[%s1639_s3 + $0x88] sm:$0xff] %vm732_vm2, %v685_v43  ;;  %782 = vst.msk [vmem:[%s1639_s3 + $0x188] sm:$0xff] %vm732_vm2, %v717_v44  ;;  %v445_v49 = vadd.f32 %v963_v47, %v1314_v1  ;;  %v605_v50 = vadd.f32 %v1011_v48, %v1314_v1  ;;  %v439_v51 = vpop.f32.mrb[19].mxu0  ;;  %v599_v52 = vpop.f32.mrb[19].mxu1 }
  0xfe   :  { %749 = vst.msk [vmem:[%s1639_s3 + $0x80] sm:$0xff] %vm732_vm2, %v684_v45  ;;  %781 = vst.msk [vmem:[%s1639_s3 + $0x180] sm:$0xff] %vm732_vm2, %v716_v46  ;;  %v440_v53 = vadd.f32 %v1314_v1, %v439_v51  ;;  %v600_v54 = vadd.f32 %v1314_v1, %v599_v52 }
  0xff   :  { %v687_v55 = vmax.f32 %v445_v49, 0.0  ;;  %v719_v56 = vmax.f32 %v605_v50, 0.0 }
 0x100   :  { %v686_v57 = vmax.f32 %v440_v53, 0.0  ;;  %v718_v58 = vmax.f32 %v600_v54, 0.0  ;;  %v966_v59 = vpop.f32.mrb[20].mxu0  ;;  %v1014_v60 = vpop.f32.mrb[20].mxu1 }
 0x101   :  { %752 = vst.msk [vmem:[%s1639_s3 + $0x98] sm:$0xff] %vm732_vm2, %v687_v55  ;;  %784 = vst.msk [vmem:[%s1639_s3 + $0x198] sm:$0xff] %vm732_vm2, %v719_v56  ;;  %v455_v61 = vadd.f32 %v966_v59, %v1314_v1  ;;  %v615_v62 = vadd.f32 %v1014_v60, %v1314_v1  ;;  %v449_v63 = vpop.f32.mrb[21].mxu0  ;;  %v609_v0 = vpop.f32.mrb[21].mxu1 }
 0x102   :  { %751 = vst.msk [vmem:[%s1639_s3 + $0x90] sm:$0xff] %vm732_vm2, %v686_v57  ;;  %783 = vst.msk [vmem:[%s1639_s3 + $0x190] sm:$0xff] %vm732_vm2, %v718_v58  ;;  %v450_v2 = vadd.f32 %v1314_v1, %v449_v63  ;;  %v610_v3 = vadd.f32 %v1314_v1, %v609_v0 }
 0x103   :  { %v689_v4 = vmax.f32 %v455_v61, 0.0  ;;  %v721_v5 = vmax.f32 %v615_v62, 0.0 }
 0x104   :  { %v688_v6 = vmax.f32 %v450_v2, 0.0  ;;  %v720_v7 = vmax.f32 %v610_v3, 0.0  ;;  %v969_v8 = vpop.f32.mrb[22].mxu0  ;;  %v1017_v9 = vpop.f32.mrb[22].mxu1 }
 0x105   :  { %754 = vst.msk [vmem:[%s1639_s3 + $0xa8] sm:$0xff] %vm732_vm2, %v689_v4  ;;  %786 = vst.msk [vmem:[%s1639_s3 + $0x1a8] sm:$0xff] %vm732_vm2, %v721_v5  ;;  %v465_v10 = vadd.f32 %v969_v8, %v1314_v1  ;;  %v625_v11 = vadd.f32 %v1017_v9, %v1314_v1  ;;  %v459_v12 = vpop.f32.mrb[23].mxu0  ;;  %v619_v13 = vpop.f32.mrb[23].mxu1 }
 0x106   :  { %753 = vst.msk [vmem:[%s1639_s3 + $0xa0] sm:$0xff] %vm732_vm2, %v688_v6  ;;  %785 = vst.msk [vmem:[%s1639_s3 + $0x1a0] sm:$0xff] %vm732_vm2, %v720_v7  ;;  %v460_v14 = vadd.f32 %v1314_v1, %v459_v12  ;;  %v620_v15 = vadd.f32 %v1314_v1, %v619_v13 }
 0x107   :  { %v691_v16 = vmax.f32 %v465_v10, 0.0  ;;  %v723_v17 = vmax.f32 %v625_v11, 0.0 }
 0x108   :  { %v690_v18 = vmax.f32 %v460_v14, 0.0  ;;  %v722_v19 = vmax.f32 %v620_v15, 0.0  ;;  %v972_v20 = vpop.f32.mrb[24].mxu0  ;;  %v1020_v21 = vpop.f32.mrb[24].mxu1 }
 0x109   :  { %756 = vst.msk [vmem:[%s1639_s3 + $0xb8] sm:$0xff] %vm732_vm2, %v691_v16  ;;  %788 = vst.msk [vmem:[%s1639_s3 + $0x1b8] sm:$0xff] %vm732_vm2, %v723_v17  ;;  %v475_v22 = vadd.f32 %v972_v20, %v1314_v1  ;;  %v635_v23 = vadd.f32 %v1020_v21, %v1314_v1  ;;  %v469_v24 = vpop.f32.mrb[25].mxu0  ;;  %v629_v25 = vpop.f32.mrb[25].mxu1 }
 0x10a   :  { %755 = vst.msk [vmem:[%s1639_s3 + $0xb0] sm:$0xff] %vm732_vm2, %v690_v18  ;;  %787 = vst.msk [vmem:[%s1639_s3 + $0x1b0] sm:$0xff] %vm732_vm2, %v722_v19  ;;  %v470_v26 = vadd.f32 %v1314_v1, %v469_v24  ;;  %v630_v27 = vadd.f32 %v1314_v1, %v629_v25 }
 0x10b   :  { %v693_v28 = vmax.f32 %v475_v22, 0.0  ;;  %v725_v29 = vmax.f32 %v635_v23, 0.0 }
 0x10c   :  { %v692_v30 = vmax.f32 %v470_v26, 0.0  ;;  %v724_v31 = vmax.f32 %v630_v27, 0.0  ;;  %v975_v32 = vpop.f32.mrb[26].mxu0  ;;  %v1023_v33 = vpop.f32.mrb[26].mxu1 }
 0x10d   :  { %758 = vst.msk [vmem:[%s1639_s3 + $0xc8] sm:$0xff] %vm732_vm2, %v693_v28  ;;  %790 = vst.msk [vmem:[%s1639_s3 + $0x1c8] sm:$0xff] %vm732_vm2, %v725_v29  ;;  %v485_v34 = vadd.f32 %v975_v32, %v1314_v1  ;;  %v645_v35 = vadd.f32 %v1023_v33, %v1314_v1  ;;  %v479_v36 = vpop.f32.mrb[27].mxu0  ;;  %v639_v37 = vpop.f32.mrb[27].mxu1 }
 0x10e   :  { %757 = vst.msk [vmem:[%s1639_s3 + $0xc0] sm:$0xff] %vm732_vm2, %v692_v30  ;;  %789 = vst.msk [vmem:[%s1639_s3 + $0x1c0] sm:$0xff] %vm732_vm2, %v724_v31  ;;  %v480_v38 = vadd.f32 %v1314_v1, %v479_v36  ;;  %v640_v39 = vadd.f32 %v1314_v1, %v639_v37 }
 0x10f   :  { %v695_v40 = vmax.f32 %v485_v34, 0.0  ;;  %v727_v41 = vmax.f32 %v645_v35, 0.0 }
 0x110   :  { %v694_v42 = vmax.f32 %v480_v38, 0.0  ;;  %v726_v43 = vmax.f32 %v640_v39, 0.0  ;;  %v978_v44 = vpop.f32.mrb[28].mxu0  ;;  %v1026_v45 = vpop.f32.mrb[28].mxu1 }
 0x111   :  { %760 = vst.msk [vmem:[%s1639_s3 + $0xd8] sm:$0xff] %vm732_vm2, %v695_v40  ;;  %792 = vst.msk [vmem:[%s1639_s3 + $0x1d8] sm:$0xff] %vm732_vm2, %v727_v41  ;;  %v495_v46 = vadd.f32 %v978_v44, %v1314_v1  ;;  %v655_v47 = vadd.f32 %v1026_v45, %v1314_v1  ;;  %v489_v48 = vpop.f32.mrb[29].mxu0  ;;  %v649_v49 = vpop.f32.mrb[29].mxu1 }
 0x112   :  { %759 = vst.msk [vmem:[%s1639_s3 + $0xd0] sm:$0xff] %vm732_vm2, %v694_v42  ;;  %791 = vst.msk [vmem:[%s1639_s3 + $0x1d0] sm:$0xff] %vm732_vm2, %v726_v43  ;;  %v490_v50 = vadd.f32 %v1314_v1, %v489_v48  ;;  %v650_v51 = vadd.f32 %v1314_v1, %v649_v49 }
 0x113   :  { %v697_v52 = vmax.f32 %v495_v46, 0.0  ;;  %v729_v53 = vmax.f32 %v655_v47, 0.0 }
 0x114   :  { %v696_v54 = vmax.f32 %v490_v50, 0.0  ;;  %v728_v55 = vmax.f32 %v650_v51, 0.0  ;;  %v981_v56 = vpop.f32.mrb[30].mxu0  ;;  %v1029_v57 = vpop.f32.mrb[30].mxu1 }
 0x115   :  { %762 = vst.msk [vmem:[%s1639_s3 + $0xe8] sm:$0xff] %vm732_vm2, %v697_v52  ;;  %794 = vst.msk [vmem:[%s1639_s3 + $0x1e8] sm:$0xff] %vm732_vm2, %v729_v53  ;;  %v505_v58 = vadd.f32 %v981_v56, %v1314_v1  ;;  %v665_v59 = vadd.f32 %v1029_v57, %v1314_v1  ;;  %v499_v60 = vpop.f32.mrb[31].mxu0  ;;  %v659_v61 = vpop.f32.mrb[31].mxu1 }
 0x116   :  { %761 = vst.msk [vmem:[%s1639_s3 + $0xe0] sm:$0xff] %vm732_vm2, %v696_v54  ;;  %793 = vst.msk [vmem:[%s1639_s3 + $0x1e0] sm:$0xff] %vm732_vm2, %v728_v55  ;;  %v500_v62 = vadd.f32 %v1314_v1, %v499_v60  ;;  %v660_v63 = vadd.f32 %v1314_v1, %v659_v61 }
 0x117   :  { %v699_v0 = vmax.f32 %v505_v58, 0.0  ;;  %v731_v2 = vmax.f32 %v665_v59, 0.0 }
 0x118   :  { %v698_v3 = vmax.f32 %v500_v62, 0.0  ;;  %v730_v4 = vmax.f32 %v660_v63, 0.0 }
 0x119   :  { %764 = vst.msk [vmem:[%s1639_s3 + $0xf8] sm:$0xff] %vm732_vm2, %v699_v0  ;;  %796 = vst.msk [vmem:[%s1639_s3 + $0x1f8] sm:$0xff] %vm732_vm2, %v731_v2 }
 0x11a   :  { %763 = vst.msk [vmem:[%s1639_s3 + $0xf0] sm:$0xff] %vm732_vm2, %v698_v3  ;;  %795 = vst.msk [vmem:[%s1639_s3 + $0x1f0] sm:$0xff] %vm732_vm2, %v730_v4 }

</bundles_post_ra>
